<compile_context>
chip_gen: v7x
topology: tpu7x:2x2x1
jax: 0.10.0
libtpu: 0.0.40
codegen_flags: <defaults>
</compile_context>

<pallas_src>
import functools
import math

import jax
import jax.numpy as jnp
import numpy as np
from jax.experimental import pallas as pl
from jax.experimental.pallas import tpu as pltpu


def _fwa_kernel(emb_ref, w_ref, b_ref, x_ref, o_ref, *, channels,
                use_affine_level):
    # emb_ref: (N, D)      noise embeddings (grid-resident)
    # w_ref:   (Cout, D)   Linear weight, PyTorch (out, in) layout (resident)
    # b_ref:   (Cout, 1)   Linear bias as a sublane column (resident)
    # x_ref:   (C, THW)    one lane-dense tile of one batch element
    # o_ref:   (C, THW)
    n = pl.program_id(0)

    # Per-batch Linear on the VPU/XLU: (Cout, D) * (1, D) -> lane-reduce.
    # Tiny (Cout*D elems), so recomputing it per HW tile is essentially free.
    emb = emb_ref[pl.ds(n, 1), :]                                       # (1, D)
    y = jnp.sum(w_ref[...] * emb, axis=-1, keepdims=True) + b_ref[...]  # (Cout, 1)

    x = x_ref[...]                                                      # (C, THW)
    if use_affine_level:
        gamma = y[:channels, :]                                         # (C, 1)
        beta = y[channels:, :]                                          # (C, 1)
        o_ref[...] = ((1.0 + gamma) * x + beta).astype(o_ref.dtype)
    else:
        o_ref[...] = (x + y).astype(o_ref.dtype)


def feature_wise_affine(x_nchw, noise_embed, weight, bias,
                        use_affine_level=False, max_lane_tile=2048):
    """Forward of FeatureWiseAffine.

    x_nchw:      (N, C, H, W) float32
    noise_embed: (N, D) float32
    weight:      (Cout, D) PyTorch Linear weight, Cout = C*(1+use_affine_level)
    bias:        (Cout,)
    returns      (N, C, H, W)
    """
    N, C, H, W = x_nchw.shape
    Cout, D = weight.shape
    assert noise_embed.shape == (N, D)
    assert Cout == C * (2 if use_affine_level else 1)

    HW = H * W

    # Lane-tile the spatial axis: largest multiple of 128 that divides HW and
    # is <= max_lane_tile; fall back to the full axis (allowed by BlockSpec)
    # when HW is small or not 128-aligned.
    if HW % 128 == 0 and HW > max_lane_tile:
        thw = max_lane_tile - (max_lane_tile % 128)
        while HW % thw:
            thw -= 128
    else:
        thw = HW
    num_hw = HW // thw

    x = x_nchw.reshape(N, C, HW)          # free reshape (contiguous trailing dims)
    b_col = bias.reshape(Cout, 1)

    kernel = functools.partial(_fwa_kernel, channels=C,
                               use_affine_level=use_affine_level)

    out = pl.pallas_call(
        kernel,
        out_shape=jax.ShapeDtypeStruct((N, C, HW), x.dtype),
        grid_spec=pltpu.PrefetchScalarGridSpec(
            num_scalar_prefetch=0,
            grid=(N, num_hw),
            in_specs=[
                pl.BlockSpec((N, D), lambda n, h: (0, 0)),        # embeddings (resident)
                pl.BlockSpec((Cout, D), lambda n, h: (0, 0)),     # weight (resident)
                pl.BlockSpec((Cout, 1), lambda n, h: (0, 0)),     # bias column (resident)
                pl.BlockSpec((None, C, thw), lambda n, h: (n, 0, h)),  # x tile (C, THW)
            ],
            out_specs=pl.BlockSpec((None, C, thw), lambda n, h: (n, 0, h)),
        ),
        compiler_params=pltpu.CompilerParams(
            dimension_semantics=("parallel", "parallel")),
    )(noise_embed, weight, b_col, x)

    return out.reshape(N, C, H, W)


def reference(x, noise_embed, weight, bias, use_affine_level):
    # Pure-JAX reference matching the PyTorch module.
    gb = noise_embed @ weight.T + bias                  # (N, Cout)
    gb = gb[:, :, None, None]                           # (N, Cout, 1, 1)
    if use_affine_level:
        C = x.shape[1]
        gamma, beta = gb[:, :C], gb[:, C:]
        return (1.0 + gamma) * x + beta
    return x + gb


if __name__ == "__main__":
    key = jax.random.PRNGKey(0)
    k_x, k_e, k_w1, k_b1, k_w2, k_b2, k_x2 = jax.random.split(key, 7)

    # batch=2, channels=4, spatial 16x16, noise-embedding width 32
    N, C, H, W = 2, 4, 16, 16
    D = 32

    x = jax.random.normal(k_x, (N, C, H, W), dtype=jnp.float32)
    noise_embed = jax.random.normal(k_e, (N, D), dtype=jnp.float32)

    # Deterministic nn.Linear-like init (kaiming-uniform bound 1/sqrt(fan_in)).
    bound = 1.0 / math.sqrt(D)

    # Default mode: use_affine_level=False -> Linear(D, C), pure bias add.
    w_plain = jax.random.uniform(k_w1, (C, D), jnp.float32, -bound, bound)
    b_plain = jax.random.uniform(k_b1, (C,), jnp.float32, -bound, bound)
    out_plain = jax.block_until_ready(
        feature_wise_affine(x, noise_embed, w_plain, b_plain,
                            use_affine_level=False))
    ref_plain = jax.block_until_ready(
        reference(x, noise_embed, w_plain, b_plain, use_affine_level=False))
    np.testing.assert_allclose(np.asarray(out_plain), np.asarray(ref_plain),
                               atol=1e-4, rtol=1e-4)

    # Affine mode: use_affine_level=True -> Linear(D, 2C), (1+gamma)*x + beta.
    w_aff = jax.random.uniform(k_w2, (2 * C, D), jnp.float32, -bound, bound)
    b_aff = jax.random.uniform(k_b2, (2 * C,), jnp.float32, -bound, bound)
    out_aff = jax.block_until_ready(
        feature_wise_affine(x, noise_embed, w_aff, b_aff,
                            use_affine_level=True))
    ref_aff = jax.block_until_ready(
        reference(x, noise_embed, w_aff, b_aff, use_affine_level=True))
    np.testing.assert_allclose(np.asarray(out_aff), np.asarray(ref_aff),
                               atol=1e-4, rtol=1e-4)

    # Larger spatial map (64x64) to exercise the lane-tiled (grid axis 1) path.
    x_big = jax.random.normal(k_x2, (N, C, 64, 64), dtype=jnp.float32)
    out_big = jax.block_until_ready(
        feature_wise_affine(x_big, noise_embed, w_aff, b_aff,
                            use_affine_level=True))
    ref_big = jax.block_until_ready(
        reference(x_big, noise_embed, w_aff, b_aff, use_affine_level=True))
    np.testing.assert_allclose(np.asarray(out_big), np.asarray(ref_big),
                               atol=1e-4, rtol=1e-4)

    print("KERNEL_OK")
</pallas_src>

<mosaic_0001>
module attributes {stable_mosaic.version = 11 : i64} {
  func.func @_fwa_kernel(%arg0: i32, %arg1: i32, %arg2: memref<2x32xf32, #tpu.memory_space<vmem>>, %arg3: memref<4x32xf32, #tpu.memory_space<vmem>>, %arg4: memref<4x1xf32, #tpu.memory_space<vmem>>, %arg5: memref<1x4x256xf32, #tpu.memory_space<vmem>>, %arg6: memref<1x4x256xf32, #tpu.memory_space<vmem>>) attributes {dimension_semantics = [#tpu.dimension_semantics<parallel>, #tpu.dimension_semantics<parallel>], iteration_bounds = array<i64: 2, 1>, scalar_prefetch = 0 : i64, scratch_operands = 0 : i64, tpu.core_type = #tpu.core_type<tc>, window_params = [{pipeline_mode = #tpu.pipeline_mode<synchronous>, transform_indices = @transform_0, window_bounds = array<i64: 2, 32>}, {pipeline_mode = #tpu.pipeline_mode<synchronous>, transform_indices = @transform_1, window_bounds = array<i64: 4, 32>}, {pipeline_mode = #tpu.pipeline_mode<synchronous>, transform_indices = @transform_2, window_bounds = array<i64: 4, 1>}, {transform_indices = @transform_3, window_bounds = array<i64: 1, 4, 256>}, {transform_indices = @transform_4, window_bounds = array<i64: 1, 4, 256>}]} {
    %0 = arith.index_cast %arg0 : i32 to index
    %c0 = arith.constant 0 : index
    %1 = vector.load %arg2[%0, %c0] : memref<2x32xf32, #tpu.memory_space<vmem>>, vector<1x32xf32>
    %c0_0 = arith.constant 0 : index
    %c0_1 = arith.constant 0 : index
    %2 = vector.load %arg3[%c0_0, %c0_1] : memref<4x32xf32, #tpu.memory_space<vmem>>, vector<4x32xf32>
    %3 = vector.broadcast %1 : vector<1x32xf32> to vector<4x32xf32>
    %4 = arith.mulf %2, %3 : vector<4x32xf32>
    %cst = arith.constant dense<0.000000e+00> : vector<4xf32>
    %5 = vector.multi_reduction <add>, %4, %cst [1] : vector<4x32xf32> to vector<4xf32>
    %6 = vector.shape_cast %5 : vector<4xf32> to vector<4x1xf32>
    %c0_2 = arith.constant 0 : index
    %c0_3 = arith.constant 0 : index
    %7 = vector.load %arg4[%c0_2, %c0_3] : memref<4x1xf32, #tpu.memory_space<vmem>>, vector<4x1xf32>
    %8 = arith.addf %6, %7 : vector<4x1xf32>
    %c0_4 = arith.constant 0 : index
    %c0_5 = arith.constant 0 : index
    %c0_6 = arith.constant 0 : index
    %9 = vector.load %arg5[%c0_4, %c0_5, %c0_6] : memref<1x4x256xf32, #tpu.memory_space<vmem>>, vector<1x4x256xf32>
    %10 = vector.shape_cast %9 : vector<1x4x256xf32> to vector<4x256xf32>
    %11 = vector.broadcast %8 : vector<4x1xf32> to vector<4x256xf32>
    %12 = arith.addf %10, %11 : vector<4x256xf32>
    %c0_7 = arith.constant 0 : index
    %c0_8 = arith.constant 0 : index
    %c0_9 = arith.constant 0 : index
    %13 = vector.load %arg6[%c0_7, %c0_8, %c0_9] : memref<1x4x256xf32, #tpu.memory_space<vmem>>, vector<1x4x256xf32>
    %14 = vector.shape_cast %13 : vector<1x4x256xf32> to vector<4x256xf32>
    %15 = vector.shape_cast %12 : vector<4x256xf32> to vector<1x4x256xf32>
    tpu.vector_store %arg6[%c0_7, %c0_8, %c0_9], %15 {strides = array<i32>} : memref<1x4x256xf32, #tpu.memory_space<vmem>>, vector<1x4x256xf32>,
    return
  }
  func.func @transform_0(%arg0: i32, %arg1: i32) -> (i32, i32) {
    %c0_i32 = arith.constant 0 : i32
    %c0_i32_0 = arith.constant 0 : i32
    %c0_i32_1 = arith.constant 0 : i32
    return %c0_i32, %c0_i32_0 : i32, i32
  }
  func.func @transform_1(%arg0: i32, %arg1: i32) -> (i32, i32) {
    %c0_i32 = arith.constant 0 : i32
    %c0_i32_0 = arith.constant 0 : i32
    %c0_i32_1 = arith.constant 0 : i32
    return %c0_i32, %c0_i32_0 : i32, i32
  }
  func.func @transform_2(%arg0: i32, %arg1: i32) -> (i32, i32) {
    %c0_i32 = arith.constant 0 : i32
    %c0_i32_0 = arith.constant 0 : i32
    %c0_i32_1 = arith.constant 0 : i32
    return %c0_i32, %c0_i32_0 : i32, i32
  }
  func.func @transform_3(%arg0: i32, %arg1: i32) -> (i32, i32, i32) {
    %c0_i32 = arith.constant 0 : i32
    %c0_i32_0 = arith.constant 0 : i32
    return %arg0, %c0_i32, %arg1 : i32, i32, i32
  }
  func.func @transform_4(%arg0: i32, %arg1: i32) -> (i32, i32, i32) {
    %c0_i32 = arith.constant 0 : i32
    %c0_i32_0 = arith.constant 0 : i32
    return %arg0, %c0_i32, %arg1 : i32, i32, i32
  }
}

</mosaic_0001>

<bundles_post_ra>
// kernel: tpu_custom_call.1
= control target key start
LH: loop header
LB: loop body
LE: loop exit
PB: predicated region body
PF: predicated region fallthrough
CT: control target
= control target key end

     0   :  { %9 = vsyncpa [#allocation3], 0  ;;  %s862_s0 = inlined_call_operand.hbm [shape: f32[2,32], index: 0, kind: input, shape index: {}]   ;;  %s863_s1 = inlined_call_operand.hbm [shape: f32[4,32], index: 1, kind: input, shape index: {}]   ;;  %s864_s2 = inlined_call_operand.vmem [shape: f32[4,1], index: 2, kind: input, shape index: {}]   ;;  %s865_s3 = inlined_call_operand.vmem [shape: f32[2,4,256], index: 3, kind: input, shape index: {}]   ;;  %s866_s4 = inlined_call_operand.hbm [shape: f32[2,4,256], index: 4, kind: output, shape index: {}]  }
   0x1   :  { %10 = vsyncpa [#allocation6], 0 }
   0x2   :  { %11 = vsyncpa [#allocation4], 0 }
   0x3   :  { %13 = vsyncpa [#allocation4 + $0x1], 0  ;;  %s671_s15 = smov 0   ;;  %s673_s16 = smov 0  }
   0x4   :  { %s675_s17 = smov 0   ;;  %s677_s18 = smov 0  }
   0x5   :  { %s679_s19 = smov 0   ;;  %s681_s20 = smov 0  }
   0x6 LB: > { %s398_s21 = sadd.s32 4294967295, %s639_s20   ;;  %s399_s22 = sadd.s32 4294967294, %s639_s20   ;;  %s639_s20 = sphi %s681_s20, %s19_s20   ;;  %s635_s19 = sphi %s679_s19, %s884_s19   ;;  %s631_s18 = sphi %s677_s18, %s883_s18   ;;  %s627_s17 = sphi %s675_s17, %s882_s17   ;;  %s623_s16 = sphi %s673_s16, %s881_s16   ;;  %s619_s15 = sphi %s671_s15, %s880_s15  }
   0x7   : > { %s31_s23 = sadd.s32 1, %s635_s19  ;;  %s131_s24 = sadd.s32 1, %s627_s17 }
   0x8   : > { %p33_p0 = scmp.ge.s32.totalorder %s31_s23, 2  ;;  %p141_p1 = scmp.ne.s32.totalorder %s627_s17, %s623_s16 }
   0x9   : > { %p142_p2 = scmp.eq.s32.totalorder %s398_s21, 1  ;;  %p147_p3 = scmp.ne.s32.totalorder %s623_s16, %s619_s15 }
   0xa   : > { %s886_s23 = smov (%p33_p0, %s31_s23), 0  ;;  %p148_p5 = scmp.eq.s32.totalorder %s399_s22, 1 }
   0xb   : > { %p711_p4 = por %p142_p2, %p141_p1  ;;  %s126_s26 = ssub.s32 %s635_s19, %s886_s23 }
   0xc   : > { %p400_p6 = scmp.ge.s32.totalorder %s639_s20, 1  ;;  %p129_p7 = scmp.eq.s32.totalorder %s126_s26, 0 }
   0xd   : > { %s871_s25 = scalar_select %p711_p4, 1, 0 }
   0xe   : > { %p718_p8 = por %p148_p5, %p147_p3  ;;  %p155_p9 = scmp.lt.s32.totalorder %s639_s20, 3 }
   0xf   : > { %s724_s28 = scalar_select %p129_p7, %s627_s17, %s131_s24  }
  0x10   : > { %s872_s27 = scalar_select %p718_p8, 1, 0 }
  0x11   : > { %p726_p10 = pnand %p400_p6, %p155_p9  ;;  %p730_p11 = scmp.eq.s32.totalorder %s398_s21, 0 }
  0x12   : > { %s641_s5 = smov [#allocation2]   ;;  %s642_s7 = smov [#allocation5]  }
  0x13   : > { %s873_s29 = scalar_select %p726_p10, 1, 0 }
  0x14   : > { %s874_s30 = scalar_select %p730_p11, 1, 0 }
  0x15   : > { %p428_p12 = pneg %p726_p10  ;;  %s168_s6 = sshll.u32 %s641_s5, 4  ;;  %s169_s6 = int_to_ptr.vmem [resolvable:$true] %s168_s6 }
  0x16   : > { %s179_s8 = sshll.u32 %s642_s7, 4  ;;  %s497_s12 = scalar_lea.hbm %s862_s0, 32  ;;  %s742_s8 = int_to_ptr.vmem [resolvable:$true] %s179_s8 }
  0x17   : > { %p738_p13 = pnand %p730_p11, %p428_p12  ;;  %p498_p0 = scmp.ne.s32.totalorder %s862_s0, %s497_s12 }
  0x18   : > { %p504_p5 = scmp.lt.u32.totalorder %s497_s12, %s862_s0 }
  0x19   : > { %p499_p1 = pneg %p738_p13 }
  0x1b   : > { %p500_p2 = pnand %p499_p1, %p498_p0 }
  0x1d   : > { %p501_p3 = pneg %p500_p2 }
  0x1f   : > { %p506_p6 = pnand %p504_p5, %p501_p3 }
  0x21   : > { %509 = shalt.err (!%p506_p6)
}
  0x22   : > { %s510_s24 = scalar_lea.vmem %s169_s6, 32  ;;  %p518_p8 = scmp.lt.s32.totalorder %s169_s6, %s169_s6 }
  0x23   : > { %p511_p7 = scmp.ne.s32.totalorder %s169_s6, %s510_s24  ;;  %p519_p4 = scmp.lt.s32.totalorder %s510_s24, %s510_s24 }
  0x25   : > { %p513_p9 = pnand %p511_p7, %p499_p1  ;;  %p520_p11 = por %p519_p4, %p518_p8 }
  0x27   : > { %p514_p12 = pneg %p513_p9 }
  0x29   : > { %p521_p10 = pnand %p520_p11, %p514_p12 }
  0x2b   : > { %524 = shalt.err (!%p521_p10)
}
  0x2c   : > { %431 = dma.hbm_to_vmem [thread:$0]  (!%p738_p13), %s862_s0, 32, %s169_s6, [#allocation3]  }
  0x2d   : > { %s525_s11 = scalar_lea.hbm %s863_s1, 64 }
  0x2e   : > { %p526_p0 = scmp.ne.s32.totalorder %s863_s1, %s525_s11  ;;  %p532_p10 = scmp.lt.u32.totalorder %s525_s11, %s863_s1 }
  0x30   : > { %p528_p4 = pnand %p526_p0, %p499_p1 }
  0x32   : > { %p529_p8 = pneg %p528_p4 }
  0x34   : > { %p534_p11 = pnand %p532_p10, %p529_p8 }
  0x36   : > { %537 = shalt.err (!%p534_p11)
}
  0x37   : > { %s538_s6 = scalar_lea.vmem %s742_s8, 64  ;;  %p546_p6 = scmp.lt.s32.totalorder %s742_s8, %s742_s8 }
  0x38   : > { %p539_p2 = scmp.ne.s32.totalorder %s742_s8, %s538_s6  ;;  %p547_p7 = scmp.lt.s32.totalorder %s538_s6, %s538_s6 }
  0x3a   : > { %p541_p3 = pnand %p539_p2, %p499_p1  ;;  %p548_p9 = por %p547_p7, %p546_p6 }
  0x3c   : > { %p542_p5 = pneg %p541_p3 }
  0x3e   : > { %p549_p12 = pnand %p548_p9, %p542_p5 }
  0x40   : > { %552 = shalt.err (!%p549_p12)
}
  0x41   : > { %434 = dma.hbm_to_vmem [thread:$0]  (!%p738_p13), %s863_s1, 64, %s742_s8, [#allocation6]  }
  0x42   : > { %p876_p0 = scmp.ne.s32.totalorder %s873_s29, 0 }
  0x43   : > { %p877_p4 = scmp.ne.s32.totalorder (!%p876_p0), %s874_s30, 0 }
  0x44   : > { %208 = sbr.rel (%p876_p0) target bundleno = 373 (0x175), region = 36 }
  0x4b   : > { %606 = dma.done.wait (%p877_p4), [#allocation3], 32  }
  0x4c   : > { %608 = vsyncadd (%p877_p4), [#allocation3], 4294967264 }
  0x4d   : > { %610 = dma.done.wait (%p877_p4), [#allocation6], 64  }
  0x4e   : > { %612 = vsyncadd (%p877_p4), [#allocation6], 4294967232  ;;  %s253_s9 = scalar_lea.vmem [#allocation2], %s631_s18  ;;  %v255_v1 = vld [vmem:[#allocation5] sm:$0xf]  ;;  %vm261_vm0 = vcmask 257024   ;;  %v275_v10 = vlaneseq }
  0x4f   : > { %v410_v0 = vld [vmem:[%s253_s9] ss:$0 sm:$0xff]  ;;  %v643_v4 = vmov 0   ;;  %p243_p13 = scmp.lt.s32.totalorder %s631_s18, 1  ;;  %v644_v8 = vmov 839922192  }
  0x50   : > { %v260_v2 = vmul.f32 %v410_v0, %v255_v1  ;;  %496 = vset.pattern.permute.xlu0 %v643_v4  ;;  %v265_v5 = vld [vmem:[%s864_s2] sm:$0xf]  ;;  %v273_v9 = vunpack.c.l.s4 %v644_v8  ;;  %s239_s26 = sand.u32 1, %s623_s16   ;;  %v276_v12 = vshrl.u32 %v275_v10, 7  ;;  %s417_s13 = sshll.u32 %s631_s18, 7 }
  0x51   : > { %s244_s30 = scalar_select %p243_p13, %s631_s18, 1 }
  0x52   : > { %v262_v3 = vsel %vm261_vm0, %v260_v2, 0.0  ;;  %v274_v11 = vunpack.c.0.s8 %v273_v9  ;;  %s407_s7 = sshll.u32 %s239_s26, 3  ;;  %s815_s24 = scalar_lea.hbm %s866_s4, %s417_s13 }
  0x53   : > { %263 = vadd.xlane.f32.xlu0 %v262_v3  ;;  %s416_s5 = sshll.u32 %s244_s30, 3  ;;  %s241_s14 = scalar_lea.vmem [#allocation7], %s407_s7 }
  0x54   : > { %s250_s12 = scalar_lea.vmem %s865_s3, %s416_s5  ;;  %v277_v13 = vsub.s32 %v274_v11, %v276_v12  ;;  %s299_s21 = sshll.u32 %s241_s14, 4  ;;  %s817_s21 = int_to_ptr.vmem [resolvable:$true] %s299_s21 }
  0x55   : > { %v267_v14 = vld [vmem:[%s250_s12] sm:$0xff]  ;;  %s283_s9 = scalar_lea.sflag [#allocation4], %s239_s26  ;;  %s553_s29 = scalar_lea.vmem %s817_s21, 128 }
  0x56   : > { %p554_p1 = scmp.ne.s32.totalorder %s817_s21, %s553_s29  ;;  %p878_p8 = scmp.ne.s32.totalorder %s871_s25, 0 }
  0x57   : > { %s645_s18 = smov [#allocation7]  }
  0x58   : > { %p555_p10 = pnand %p554_p1, %p878_p8  ;;  %s557_s8 = sshll.u32 %s645_s18, 4  ;;  %s558_s8 = int_to_ptr.vmem [resolvable:$false] %s557_s8 }
  0x59   : > { %s559_s30 = scalar_lea.vmem %s558_s8, 256  ;;  %p560_p2 = scmp.lt.s32.totalorder %s817_s21, %s558_s8 }
  0x5a   : > { %p556_p11 = pneg %p555_p10  ;;  %p561_p3 = scmp.lt.s32.totalorder %s559_s30, %s553_s29 }
  0x5c   : > { %p562_p5 = por %p561_p3, %p560_p2 }
  0x5e   : > { %p563_p6 = pnand %p562_p5, %p556_p11 }
  0xe0   : > { %v264_v6 = vpop.xlane.xlu0 %263 }
  0xe1   : > { %v266_v7 = vadd.f32 %v265_v5, %v264_v6 }
  0xe3   : > { %270 = vperm.xlu0 %496, %v266_v7  }
 0x162   : > { %v271_v15 = vpop.permute.xlu0 %270 }
 0x163   : > { %v278_v16 = vrot.slane %v271_v15, %v277_v13 }
 0x165   : > { %v280_v17 = vadd.f32 %v278_v16, %v267_v14 }
 0x167   : > { %281 = vst [vmem:[%s241_s14] sm:$0xff] %v280_v17 }
 0x168   : > { %566 = shalt.err (!%p563_p6)
}
 0x169   : > { %s567_s26 = scalar_lea.hbm %s815_s24, 128  ;;  %s571_s10 = scalar_lea.hbm %s866_s4, 256 }
 0x16a   : > { %p568_p7 = scmp.ne.s32.totalorder %s815_s24, %s567_s26  ;;  %p572_p0 = scmp.lt.u32.totalorder %s815_s24, %s866_s4 }
 0x16b   : > { %p573_p4 = scmp.lt.u32.totalorder %s571_s10, %s567_s26  ;;  %p575_p1 = scmp.lt.u32.totalorder %s567_s26, %s815_s24 }
 0x16c   : > { %p569_p9 = pnand %p568_p7, %p878_p8 }
 0x16d   : > { %p574_p13 = por %p573_p4, %p572_p0 }
 0x16e   : > { %p570_p12 = pneg %p569_p9 }
 0x16f   : > { %p576_p10 = por %p575_p1, %p574_p13 }
 0x171   : > { %p577_p11 = pnand %p576_p10, %p570_p12 }
 0x173   : > { %580 = shalt.err (!%p577_p11)
}
 0x174   : > { %426 = dma.vmem_to_hbm [thread:$0]  (%p878_p8), %s817_s21, 128, %s815_s24, %s283_s9  }
 0x175 PF: > { %p443_p2 = scmp.ge.s32.totalorder %s639_s20, 2  ;;  %s311_s13 = sand.u32 1, %s619_s15  }
 0x176   : > { %p879_p3 = scmp.ne.s32.totalorder %s872_s27, 0  ;;  %s312_s14 = scalar_lea.sflag [#allocation4], %s311_s13 }
 0x178   : > { %p436_p5 = pnand %p443_p2, %p879_p3 }
 0x17a   : > { %614 = dma.done.wait (!%p436_p5), %s312_s14, 128  }
 0x17b   : > { %616 = vsyncadd (!%p436_p5), %s312_s14, 4294967168  ;;  %s19_s20 = sadd.s32 1, %s639_s20   ;;  %s880_s15 = smov %s623_s16 }
 0x17c   : > { %p16_p6 = scmp.ge.s32.totalorder %s19_s20, 4   ;;  %s881_s16 = smov %s627_s17 }
 0x17d   : > { %s882_s17 = smov %s724_s28  ;;  %s883_s18 = smov %s635_s19 }
 0x17e   : > { %s884_s19 = smov %s886_s23  ;;  %18 = sbr.rel (!%p16_p6) target bundleno = 6 (0x6), region = 81 }
 0x185   :  { %317 = vsyncpa [#allocation3], 1 }
 0x186   :  { %319 = vsyncpa [#allocation3 + $0x1], 1 }
 0x187   :  { %320 = vsyncpa [#allocation6], 1 }
 0x188   :  { %321 = vsyncpa [#allocation4], 1 }
 0x189   :  { %323 = vsyncpa [#allocation4 + $0x1], 1 }

</bundles_post_ra>
